<compile_context>
chip_gen: v7x
topology: tpu7x:2x2x1
jax: 0.10.0
libtpu: 0.0.40
codegen_flags: <defaults>
</compile_context>

<pallas_src>
import jax
import jax.numpy as jnp
from jax.experimental import pallas as pl
from jax.experimental.pallas import tpu as pltpu


# ---------------------------------------------------------------------------
# Pallas kernel: one (TN, C, TM) activation tile per grid step.
# ---------------------------------------------------------------------------
def sa_layer_kernel(x_ref, w1_ref, b1_ref, w2_ref, b2_ref, o_ref):
    # x_ref/o_ref: (TN, C, TM)   activation tile (pixels on lanes, native dtype)
    # w1_ref:      (Cr, C)       squeeze 1x1 conv weight  (f32)
    # b1_ref:      (Cr, 1)
    # w2_ref:      (C,  Cr)      excite 1x1 conv weight   (f32)
    # b2_ref:      (C,  1)
    w1 = w1_ref[...]
    b1 = b1_ref[...]
    w2 = w2_ref[...]
    b2 = b2_ref[...]
    # TN is a small static block dim (1 for pixel-tiled grids); unrolled loop.
    for b in range(x_ref.shape[0]):
        x = x_ref[b].astype(jnp.float32)                                   # (C, TM)
        z = jnp.dot(w1, x, preferred_element_type=jnp.float32) + b1        # (Cr, TM)
        z = jnp.maximum(z, 0.0)                                            # ReLU
        g = jnp.dot(w2, z, preferred_element_type=jnp.float32) + b2        # (C, TM)
        # sigmoid: exp -> EUP, approximate reciprocal -> EUP (no VALU divide)
        gate = pl.reciprocal(1.0 + jnp.exp(-g), approx=True)
        o_ref[b] = (x * gate).astype(o_ref.dtype)


# ---------------------------------------------------------------------------
# JAX wrapper: transpose-free layout plumbing + pallas_call.
# ---------------------------------------------------------------------------
_TILE_BUDGET_BYTES = 2 * 1024 * 1024  # ~2 MiB activation tile; ~8 MiB double-buffered


@jax.jit
def sa_layer_pallas(x_nchw, params):
    N, C, H, W = x_nchw.shape
    w1 = params["w1"].reshape(params["w1"].shape[0], C).astype(jnp.float32)   # (Cr, C)
    b1 = params["b1"].astype(jnp.float32)                                     # (Cr,)
    w2 = params["w2"].reshape(params["w2"].shape[0], -1).astype(jnp.float32)  # (Cout, Cr)
    b2 = params["b2"].astype(jnp.float32)                                     # (Cout,)
    Cr = w1.shape[0]
    Cout = w2.shape[0]
    assert Cout == C, "SALayer's x * y requires out_channel == in_channel"

    HW = H * W
    x_flat = x_nchw.reshape(N, C, HW)          # free view of NCHW, no data movement
    itemsize = jnp.dtype(x_nchw.dtype).itemsize

    # Pick the tile from a VMEM budget (not a fixed small lane count).
    lane_budget = max(128, (_TILE_BUDGET_BYTES // max(1, C * itemsize)) // 128 * 128)
    if HW > lane_budget:
        # Large images: tile the pixel axis (lane-dense, multiple of 128).
        tn, tm = 1, lane_budget
    else:
        # Small images: keep the full pixel row, tile the batch axis instead so
        # per-step bytes stay large; keep >= 2 grid steps when N >= 2 (megacore).
        tm = HW
        tn_budget = max(1, _TILE_BUDGET_BYTES // max(1, C * HW * itemsize))
        tn = max(1, min(tn_budget, N // 2)) if N >= 2 else 1

    grid = (pl.cdiv(N, tn), pl.cdiv(HW, tm))

    out_flat = pl.pallas_call(
        sa_layer_kernel,
        out_shape=jax.ShapeDtypeStruct((N, C, HW), x_nchw.dtype),
        grid=grid,
        in_specs=[
            pl.BlockSpec((tn, C, tm), lambda n, i: (n, 0, i)),   # activations (streamed)
            pl.BlockSpec((Cr, C), lambda n, i: (0, 0)),          # weights: VMEM-resident
            pl.BlockSpec((Cr, 1), lambda n, i: (0, 0)),
            pl.BlockSpec((C, Cr), lambda n, i: (0, 0)),
            pl.BlockSpec((C, 1), lambda n, i: (0, 0)),
        ],
        out_specs=pl.BlockSpec((tn, C, tm), lambda n, i: (n, 0, i)),
        compiler_params=pltpu.CompilerParams(
            dimension_semantics=("parallel", "parallel")),        # megacore sharding
    )(x_flat, w1, b1.reshape(Cr, 1), w2, b2.reshape(C, 1))

    return out_flat.reshape(N, C, H, W)        # free reshape back to NCHW


# ---------------------------------------------------------------------------
# Pure-JAX reference (matches the PyTorch module: Conv2d k=1 with bias).
# ---------------------------------------------------------------------------
def sa_layer_ref(x_nchw, params):
    dn = ("NCHW", "OIHW", "NCHW")
    y = jax.lax.conv_general_dilated(x_nchw, params["w1"], (1, 1), "VALID",
                                     dimension_numbers=dn)
    y = y + params["b1"][None, :, None, None]
    y = jnp.maximum(y, 0.0)
    y = jax.lax.conv_general_dilated(y, params["w2"], (1, 1), "VALID",
                                     dimension_numbers=dn)
    y = y + params["b2"][None, :, None, None]
    y = jax.nn.sigmoid(y)
    return x_nchw * y


# ---------------------------------------------------------------------------
if __name__ == "__main__":
    # SALayer(in_channel=16, out_channel=16, reduction=4); small spatial size.
    N, C, H, W = 2, 16, 16, 16
    reduction = 4
    Cr = C // reduction

    key = jax.random.PRNGKey(0)
    ks = jax.random.split(key, 5)
    params = {
        # PyTorch Conv2d(k=1) weight layout: (out_ch, in_ch, 1, 1)
        "w1": 0.1 * jax.random.normal(ks[0], (Cr, C, 1, 1), jnp.float32),
        "b1": 0.01 * jax.random.normal(ks[1], (Cr,), jnp.float32),
        "w2": 0.1 * jax.random.normal(ks[2], (C, Cr, 1, 1), jnp.float32),
        "b2": 0.01 * jax.random.normal(ks[3], (C,), jnp.float32),
    }
    x = jax.random.normal(ks[4], (N, C, H, W), jnp.float32)   # NCHW, like PyTorch

    out = jax.block_until_ready(sa_layer_pallas(x, params))
    ref = jax.block_until_ready(sa_layer_ref(x, params))

    assert out.shape == x.shape and out.dtype == x.dtype
    max_err = float(jnp.max(jnp.abs(out - ref)))
    mean_err = float(jnp.mean(jnp.abs(out - ref)))
    # Tolerance accounts for the EUP approximate reciprocal in the sigmoid.
    assert max_err < 2e-2 and mean_err < 2e-3, (
        f"mismatch vs reference: max_err={max_err} mean_err={mean_err}")

    print("KERNEL_OK")
</pallas_src>

<mosaic_0001>
module attributes {stable_mosaic.version = 11 : i64} {
  func.func @sa_layer_kernel(%arg0: i32, %arg1: i32, %arg2: memref<1x16x256xf32, #tpu.memory_space<vmem>>, %arg3: memref<4x16xf32, #tpu.memory_space<vmem>>, %arg4: memref<4x1xf32, #tpu.memory_space<vmem>>, %arg5: memref<16x4xf32, #tpu.memory_space<vmem>>, %arg6: memref<16x1xf32, #tpu.memory_space<vmem>>, %arg7: memref<1x16x256xf32, #tpu.memory_space<vmem>>) attributes {dimension_semantics = [#tpu.dimension_semantics<parallel>, #tpu.dimension_semantics<parallel>], iteration_bounds = array<i64: 2, 1>, scalar_prefetch = 0 : i64, scratch_operands = 0 : i64, tpu.core_type = #tpu.core_type<tc>, window_params = [{transform_indices = @transform_0, window_bounds = array<i64: 1, 16, 256>}, {pipeline_mode = #tpu.pipeline_mode<synchronous>, transform_indices = @transform_1, window_bounds = array<i64: 4, 16>}, {pipeline_mode = #tpu.pipeline_mode<synchronous>, transform_indices = @transform_2, window_bounds = array<i64: 4, 1>}, {pipeline_mode = #tpu.pipeline_mode<synchronous>, transform_indices = @transform_3, window_bounds = array<i64: 16, 4>}, {pipeline_mode = #tpu.pipeline_mode<synchronous>, transform_indices = @transform_4, window_bounds = array<i64: 16, 1>}, {transform_indices = @transform_5, window_bounds = array<i64: 1, 16, 256>}]} {
    %c0 = arith.constant 0 : index
    %c0_0 = arith.constant 0 : index
    %0 = vector.load %arg3[%c0, %c0_0] : memref<4x16xf32, #tpu.memory_space<vmem>>, vector<4x16xf32>
    %c0_1 = arith.constant 0 : index
    %c0_2 = arith.constant 0 : index
    %1 = vector.load %arg4[%c0_1, %c0_2] : memref<4x1xf32, #tpu.memory_space<vmem>>, vector<4x1xf32>
    %c0_3 = arith.constant 0 : index
    %c0_4 = arith.constant 0 : index
    %2 = vector.load %arg5[%c0_3, %c0_4] : memref<16x4xf32, #tpu.memory_space<vmem>>, vector<16x4xf32>
    %c0_5 = arith.constant 0 : index
    %c0_6 = arith.constant 0 : index
    %3 = vector.load %arg6[%c0_5, %c0_6] : memref<16x1xf32, #tpu.memory_space<vmem>>, vector<16x1xf32>
    %c0_7 = arith.constant 0 : index
    %c0_8 = arith.constant 0 : index
    %c0_9 = arith.constant 0 : index
    %4 = vector.load %arg2[%c0_7, %c0_8, %c0_9] : memref<1x16x256xf32, #tpu.memory_space<vmem>>, vector<1x16x256xf32>
    %5 = vector.shape_cast %4 : vector<1x16x256xf32> to vector<16x256xf32>
    %cst = arith.constant dense<0.000000e+00> : vector<4x256xf32>
    %6 = tpu.matmul %0, %5, %cst {dimension_numbers = #tpu.dot_dimension_numbers<[1], [0], [0], [1], [0, 0, 1, 1], [], []>} : vector<4x16xf32>, vector<16x256xf32>, vector<4x256xf32> -> vector<4x256xf32>
    %7 = vector.broadcast %1 : vector<4x1xf32> to vector<4x256xf32>
    %8 = arith.addf %6, %7 : vector<4x256xf32>
    %cst_10 = arith.constant 0.000000e+00 : f32
    %9 = vector.broadcast %cst_10 : f32 to vector<4x256xf32>
    %10 = arith.maximumf %8, %9 : vector<4x256xf32>
    %cst_11 = arith.constant dense<0.000000e+00> : vector<16x256xf32>
    %11 = tpu.matmul %2, %10, %cst_11 {dimension_numbers = #tpu.dot_dimension_numbers<[1], [0], [0], [1], [0, 0, 1, 1], [], []>} : vector<16x4xf32>, vector<4x256xf32>, vector<16x256xf32> -> vector<16x256xf32>
    %12 = vector.broadcast %3 : vector<16x1xf32> to vector<16x256xf32>
    %13 = arith.addf %11, %12 : vector<16x256xf32>
    %cst_12 = arith.constant 0.000000e+00 : f32
    %14 = vector.broadcast %cst_12 : f32 to vector<16x256xf32>
    %15 = arith.subf %14, %13 : vector<16x256xf32>
    %16 = math.exp %15 : vector<16x256xf32>
    %cst_13 = arith.constant 1.000000e+00 : f32
    %17 = vector.broadcast %cst_13 : f32 to vector<16x256xf32>
    %18 = arith.addf %17, %16 : vector<16x256xf32>
    %19 = tpu.reciprocal %18 {approx = true} : vector<16x256xf32> -> vector<16x256xf32>
    %20 = arith.mulf %5, %19 : vector<16x256xf32>
    %c0_14 = arith.constant 0 : index
    %c0_15 = arith.constant 0 : index
    %c0_16 = arith.constant 0 : index
    %21 = vector.load %arg7[%c0_14, %c0_15, %c0_16] : memref<1x16x256xf32, #tpu.memory_space<vmem>>, vector<1x16x256xf32>
    %22 = vector.shape_cast %21 : vector<1x16x256xf32> to vector<16x256xf32>
    %23 = vector.shape_cast %20 : vector<16x256xf32> to vector<1x16x256xf32>
    tpu.vector_store %arg7[%c0_14, %c0_15, %c0_16], %23 {strides = array<i32>} : memref<1x16x256xf32, #tpu.memory_space<vmem>>, vector<1x16x256xf32>,
    return
  }
  func.func @transform_0(%arg0: i32, %arg1: i32) -> (i32, i32, i32) {
    %c0_i32 = arith.constant 0 : i32
    %c0_i32_0 = arith.constant 0 : i32
    return %arg0, %c0_i32, %arg1 : i32, i32, i32
  }
  func.func @transform_1(%arg0: i32, %arg1: i32) -> (i32, i32) {
    %c0_i32 = arith.constant 0 : i32
    %c0_i32_0 = arith.constant 0 : i32
    %c0_i32_1 = arith.constant 0 : i32
    return %c0_i32, %c0_i32_0 : i32, i32
  }
  func.func @transform_2(%arg0: i32, %arg1: i32) -> (i32, i32) {
    %c0_i32 = arith.constant 0 : i32
    %c0_i32_0 = arith.constant 0 : i32
    %c0_i32_1 = arith.constant 0 : i32
    return %c0_i32, %c0_i32_0 : i32, i32
  }
  func.func @transform_3(%arg0: i32, %arg1: i32) -> (i32, i32) {
    %c0_i32 = arith.constant 0 : i32
    %c0_i32_0 = arith.constant 0 : i32
    %c0_i32_1 = arith.constant 0 : i32
    return %c0_i32, %c0_i32_0 : i32, i32
  }
  func.func @transform_4(%arg0: i32, %arg1: i32) -> (i32, i32) {
    %c0_i32 = arith.constant 0 : i32
    %c0_i32_0 = arith.constant 0 : i32
    %c0_i32_1 = arith.constant 0 : i32
    return %c0_i32, %c0_i32_0 : i32, i32
  }
  func.func @transform_5(%arg0: i32, %arg1: i32) -> (i32, i32, i32) {
    %c0_i32 = arith.constant 0 : i32
    %c0_i32_0 = arith.constant 0 : i32
    return %arg0, %c0_i32, %arg1 : i32, i32, i32
  }
}

</mosaic_0001>

<bundles_post_ra>
// kernel: sa_layer_pallas.1
= control target key start
LH: loop header
LB: loop body
LE: loop exit
PB: predicated region body
PF: predicated region fallthrough
CT: control target
= control target key end

     0   :  { %s694_s18 = smov 0   ;;  %s696_s19 = smov 0   ;;  %s768_s0 = inlined_call_operand.vmem [shape: f32[2,16,256], index: 0, kind: input, shape index: {}]   ;;  %s769_s1 = inlined_call_operand.vmem [shape: f32[4,16], index: 1, kind: input, shape index: {}]   ;;  %s770_s2 = inlined_call_operand.vmem [shape: f32[4,1], index: 2, kind: input, shape index: {}]   ;;  %s771_s3 = inlined_call_operand.vmem [shape: f32[16,4], index: 3, kind: input, shape index: {}]   ;;  %s772_s4 = inlined_call_operand.vmem [shape: f32[16,1], index: 4, kind: input, shape index: {}]   ;;  %s773_s5 = inlined_call_operand.vmem [shape: f32[2,16,256], index: 5, kind: output, shape index: {}]  }
   0x1   :  { %s698_s20 = smov 0  }
   0x2 LB: > { %s27_s21 = sadd.s32 1, %s656_s19  ;;  %p576_p0 = scmp.ge.s32.totalorder %s660_s20, 1  ;;  %s660_s20 = sphi %s698_s20, %s15_s20   ;;  %s656_s19 = sphi %s696_s19, %s775_s19   ;;  %s652_s18 = sphi %s694_s18, %s774_s18  }
   0x3   : > { %p29_p1 = scmp.ge.s32.totalorder %s27_s21, 2  ;;  %p208_p2 = scmp.lt.s32.totalorder %s660_s20, 3 }
   0x5   : > { %s777_s21 = smov (%p29_p1, %s27_s21), 0  ;;  %p209_p3 = pnand %p576_p0, %p208_p2 }
   0x6   : > { %p245_p4 = scmp.lt.s32.totalorder (!%p209_p3), %s652_s18, 1  ;;  %v662_v0 = vmov (!%p209_p3), 0.0   ;;  %v663_v1 = vmov (!%p209_p3), 0   ;;  %v265_v2 = vld [vmem:[%s770_s2] sm:$0xf] (!%p209_p3)  ;;  %vm279_vm0 = vcmask (!%p209_p3), 130048  }
   0x7   : > { %212 = sbr.rel (%p209_p3) target bundleno = 493 (0x1ed), region = 40  ;;  %347 = vmatprep.mubr.f32.mxu0 (!%p209_p3), %v662_v0  ;;  %620 = vset.pattern.permute.xlu0 (!%p209_p3), %v663_v1  ;;  %v268_v3 = vld [vmem:[%s772_s4] sm:$0xff] (!%p209_p3)  ;;  %v269_v11 = vld [vmem:[%s772_s4 + $0x8] sm:$0xff] (!%p209_p3)  ;;  %vm373_vm1 = vcmask (!%p209_p3), 1043456   ;;  %vm366_vm2 = vcmask (!%p209_p3), 31744  }
   0x8   : > { %276 = vperm.xlu0 (!%p209_p3), %620, %v265_v2   ;;  %444 = vmatprep.mubr.f32.mxu1 (!%p209_p3), %v662_v0  ;;  %v264_v10 = vld [vmem:[%s769_s1] sm:$0xf] (!%p209_p3)  ;;  %v267_v20 = vld [vmem:[%s771_s3 + $0x8] sm:$0xff] (!%p209_p3) }
   0x9   : > { %621 = vset.pattern.permute.xlu1 (!%p209_p3), %v663_v1  ;;  %v266_v19 = vld [vmem:[%s771_s3] sm:$0xff] (!%p209_p3) }
   0xa   : > { %363 = vperm.xlu1 (!%p209_p3), %621, %v269_v11  }
   0xc   : > { %358 = vperm.xlu0 (!%p209_p3), %620, %v268_v3  }
   0xe   : > { %s779_s18 = smov (!%p245_p4, %s652_s18), 1 }
   0xf   : > { %s588_s26 = sshll.u32 %s779_s18, 5 }
  0x10   : > { %s252_s29 = scalar_lea.vmem %s768_s0, %s588_s26  ;;  %s262_s15 = scalar_lea.vmem %s773_s5, %s588_s26 }
  0x11   : > { %v726_v4 = vld [vmem:[%s252_s29 + $0x8] sm:$0xff]  ;;  %v728_v5 = vld [vmem:[%s252_s29 + $0x18] sm:$0xff]  ;;  %v730_v6 = vld [vmem:[%s252_s29] sm:$0xff] }
  0x12   : > { %v590_v7 = vpack.c.bf16 %v728_v5, %v726_v4  ;;  %v734_v8 = vld [vmem:[%s252_s29 + $0x10] sm:$0xff] }
  0x13   : > { %v592_v9 = vpack.c.bf16 %v734_v8, %v730_v6 }
  0x14   : > { %591 = vmatprep.subr.bf16.mxu0 %v590_v7 }
  0x15   : > { %593 = vmatpush1.bf16.msra.mxu0 %v592_v9 }
  0x18   : > { %581 = vmatmul.mubr.msk.f32.vlgmr.msra.gmra.mrb[0].mxu0 %vm279_vm0, %v264_v10 }
  0x87   : > { %v277_v12 = vpop.permute.xlu0 %276 }
  0x89   : > { %v364_v26 = vpop.permute.xlu1 %363 }
  0x8b   : > { %v359_v21 = vpop.permute.xlu0 %358 }
  0xeb   : > { %v349_v13 = vpop.f32.mrb[0].mxu0 }
  0xec   : > { %v350_v14 = vadd.f32 %v349_v13, %v277_v12  ;;  %v351_v15 = vpop.f32.mrb[1].mxu0 }
  0xed   : > { %v352_v16 = vadd.f32 %v351_v15, %v277_v12 }
  0xee   : > { %v354_v18 = vmax.f32 %v350_v14, 0.0 }
  0xef   : > { %v355_v17 = vmax.f32 %v352_v16, 0.0 }
  0xf1   : > { %582 = vmatprep.subr.msk.mxu1 %vm373_vm1, %v355_v17 }
  0xf2   : > { %583 = vmatpush1.msk.msra.mxu1 %vm373_vm1, %v354_v18 }
  0xf3   : > { %584 = vmatmul.mubr.msk.f32.vlgmr.msra.gmra.mrb[0].mxu1 %vm366_vm2, %v266_v19 }
  0xf4   : > { %450 = vmatprep.mubr.f32.mxu1 %v662_v0 }
  0xf7   : > { %585 = vmatmul.mubr.msk.f32.gmra.mrb[2].mxu1 %vm366_vm2, %v267_v20 }
 0x1c6   : > { %v446_v22 = vpop.f32.mrb[0].mxu1 }
 0x1c7   : > { %v447_v23 = vadd.f32 %v446_v22, %v359_v21  ;;  %v448_v24 = vpop.f32.mrb[1].mxu1 }
 0x1c8   : > { %v449_v25 = vadd.f32 %v448_v24, %v359_v21 }
 0x1c9   : > { %v457_v27 = vsub.f32 0.0, %v447_v23 }
 0x1ca   : > { %v458_v28 = vsub.f32 0.0, %v449_v25  ;;  %v452_v29 = vpop.f32.mrb[2].mxu1 }
 0x1cb   : > { %v461_v30 = vmul.f32 1.442695, %v457_v27  ;;  %v453_v31 = vadd.f32 %v452_v29, %v364_v26  ;;  %v454_v32 = vpop.f32.mrb[3].mxu1 }
 0x1cc   : > { %v463_v33 = vmul.f32 1.442695, %v458_v28  ;;  %v455_v34 = vadd.f32 %v454_v32, %v364_v26 }
 0x1cd   : > { %622 = vpow2.f32 %v461_v30  ;;  %v459_v35 = vsub.f32 0.0, %v453_v31 }
 0x1ce   : > { %624 = vpow2.f32 %v463_v33  ;;  %v460_v36 = vsub.f32 0.0, %v455_v34 }
 0x1cf   : > { %v465_v37 = vmul.f32 1.442695, %v459_v35 }
 0x1d0   : > { %v467_v38 = vmul.f32 1.442695, %v460_v36 }
 0x1d1   : > { %626 = vpow2.f32 %v465_v37 }
 0x1d2   : > { %628 = vpow2.f32 %v467_v38 }
 0x1d7   : > { %v623_v39 = vpop.eup %622 }
 0x1d8   : > { %v625_v40 = vpop.eup %624  ;;  %v469_v41 = vadd.f32 1.0, %v623_v39 }
 0x1d9   : > { %v470_v42 = vadd.f32 1.0, %v625_v40 }
 0x1da   : > { %630 = vrcp.f32 %v469_v41 }
 0x1db   : > { %v627_v43 = vpop.eup %626  ;;  %632 = vrcp.f32 %v470_v42 }
 0x1dc   : > { %v629_v44 = vpop.eup %628  ;;  %v471_v45 = vadd.f32 1.0, %v627_v43 }
 0x1dd   : > { %v472_v46 = vadd.f32 1.0, %v629_v44 }
 0x1de   : > { %634 = vrcp.f32 %v471_v45 }
 0x1df   : > { %636 = vrcp.f32 %v472_v46 }
 0x1e4   : > { %v631_v47 = vpop.eup %630 }
 0x1e5   : > { %v633_v48 = vpop.eup %632  ;;  %v477_v49 = vmul.f32 %v631_v47, %v730_v6 }
 0x1e6   : > { %v478_v50 = vmul.f32 %v633_v48, %v726_v4 }
 0x1e7   : > { %481 = vst [vmem:[%s262_s15] sm:$0xff] %v477_v49 }
 0x1e8   : > { %v635_v51 = vpop.eup %634  ;;  %482 = vst [vmem:[%s262_s15 + $0x8] sm:$0xff] %v478_v50 }
 0x1e9   : > { %v637_v52 = vpop.eup %636  ;;  %v479_v53 = vmul.f32 %v635_v51, %v734_v8 }
 0x1ea   : > { %v480_v54 = vmul.f32 %v637_v52, %v728_v5 }
 0x1eb   : > { %483 = vst [vmem:[%s262_s15 + $0x10] sm:$0xff] %v479_v53 }
 0x1ec   : > { %484 = vst [vmem:[%s262_s15 + $0x18] sm:$0xff] %v480_v54 }
 0x1ed PF: > { %s15_s20 = sadd.s32 1, %s660_s20   ;;  %s774_s18 = smov %s656_s19 }
 0x1ee   : > { %p12_p5 = scmp.ge.s32.totalorder %s15_s20, 4   ;;  %s775_s19 = smov %s777_s21 }
 0x1f0   :  { %14 = sbr.rel (!%p12_p5) target bundleno = 2 (0x2), region = 70 }

</bundles_post_ra>
